<compile_context>
chip_gen: v5e
topology: v5e:2x2
jax: 0.10.0
libtpu: 0.0.40
codegen_flags: <defaults>
</compile_context>

<pallas_src>
import functools

import jax
import jax.numpy as jnp
from jax.experimental import pallas as pl
from jax.experimental.pallas import tpu as pltpu


def _round_up(n, m):
    return ((n + m - 1) // m) * m


def _vmem_capacity_bytes():
    """Per-TensorCore VMEM capacity; conservative fallback (v7x = 64 MiB)."""
    try:
        info = pltpu.get_tpu_info()
        cap = getattr(info, "vmem_capacity_bytes", None)
        if cap:
            return int(cap)
    except Exception:
        pass
    return 64 << 20


def _supports_buffered():
    return hasattr(pl, "Buffered")


def _vmem_estimate(tn, h, dp, act_bytes, w_bytes, n_h_out, weight_bufs):
    """Rough VMEM footprint: pipelined activation tiles + resident params + f32 temps."""
    act = 2 * act_bytes * tn * ((2 + n_h_out) * h + dp)       # double-buffered row tiles
    wts = weight_bufs * w_bytes * (2 * h * dp + 3 * h + dp)   # resident weights/biases
    tmp = 4 * tn * (3 * h + 2 * dp)                           # in-kernel f32 temporaries
    return act + wts + tmp


def _adapter_kernel(x_ref, res_ref, ln_w_ref, ln_b_ref,
                    wd_ref, bd_ref, wu_ref, bu_ref,
                    out_ref, down_ref, up_ref=None, *, n_rows=None):
    """One row-tile of: LayerNorm -> Linear(down) -> ReLU -> Linear(up) -> + residual."""
    x = x_ref[...].astype(jnp.float32)

    # Tail-block masking: only traced when the grid does not evenly divide the rows.
    if n_rows is not None:
        tn = x.shape[0]
        rows = pl.program_id(0) * tn + jax.lax.broadcasted_iota(jnp.int32, (tn, 1), 0)
        x = jnp.where(rows < n_rows, x, 0.0)

    # ---- LayerNorm (adapter_norm_before), two-pass stats in f32, eps = 1e-5 ----
    inv_h = jnp.float32(1.0 / x.shape[-1])
    mean = jnp.sum(x, axis=-1, keepdims=True) * inv_h
    xc = x - mean
    var = jnp.sum(xc * xc, axis=-1, keepdims=True) * inv_h
    xn = xc * jax.lax.rsqrt(var + 1e-5)
    xn = xn * ln_w_ref[...].astype(jnp.float32) + ln_b_ref[...].astype(jnp.float32)

    # ---- down projection + ReLU: MXU operands in weight dtype, f32 accumulation ----
    cdt = wd_ref.dtype
    down = jnp.dot(xn.astype(cdt), wd_ref[...], preferred_element_type=jnp.float32)
    down = jnp.maximum(down + bd_ref[...].astype(jnp.float32), 0.0)

    # ---- up projection ----
    up = jnp.dot(down.astype(cdt), wu_ref[...], preferred_element_type=jnp.float32)
    up = up + bu_ref[...].astype(jnp.float32)

    # ---- residual (residual_before_ln=True, add_layer_norm_after=False) ----
    out_ref[...] = (up + res_ref[...].astype(jnp.float32)).astype(out_ref.dtype)
    down_ref[...] = down.astype(down_ref.dtype)
    if up_ref is not None:            # optional extra N x H HBM write (off by default)
        up_ref[...] = up.astype(up_ref.dtype)


def adapter_forward(x, residual_input, params, *, block_rows=None, return_up=False):
    """x, residual_input: (B, S, H). Returns (output, down, up) like the PyTorch module.

    block_rows: row-tile size override; by default it is auto-sized from the chip's
    VMEM capacity (roughly 512-1024 rows on v5e/v6e, 256-512 on v7x).
    return_up=False (default) skips the redundant (N, H) `up` HBM writeback.
    """
    B, S, H = x.shape
    D = params["w_down"].shape[1]
    N = B * S
    out_dtype = x.dtype

    # Lane-dense down projection: pad D to a multiple of 128.  Zero-padded columns give
    # relu(0 + 0) = 0 and the matching zero rows of w_up contribute nothing, so results
    # are unchanged; the padded `down` columns are sliced off afterwards.
    Dp = _round_up(D, 128)

    act_b = jnp.dtype(out_dtype).itemsize
    w_b = jnp.dtype(params["w_down"].dtype).itemsize
    n_h_out = 2 if return_up else 1
    weight_bufs = 1 if _supports_buffered() else 2

    vmem_cap = _vmem_capacity_bytes()
    budget = vmem_cap - (8 << 20)

    # Row tile: largest candidate whose footprint fits the per-core VMEM budget.
    max_tn = _round_up(N, 8)
    if block_rows is None:
        TN = 8
        for cand in (1024, 768, 512, 384, 256, 192, 128, 64, 32, 16, 8):
            if _vmem_estimate(cand, H, Dp, act_b, w_b, n_h_out, weight_bufs) <= budget:
                TN = cand
                break
    else:
        TN = _round_up(block_rows, 8)
    TN = max(8, min(TN, max_tn))
    # TODO(synk): for very large H where w_down/w_up cannot stay resident in VMEM even
    # single-buffered (v7x 64 MiB), add a second "arbitrary" grid axis tiling H with an
    # f32 accumulator scratch instead of keeping both full matrices resident.

    grid = (pl.cdiv(N, TN),)                  # no host-side padding of x / residual
    n_rows_arg = N if (N % TN) else None      # mask tail rows in-kernel only if needed

    w_down, b_down, w_up = params["w_down"], params["b_down"], params["w_up"]
    if Dp != D:
        w_down = jnp.pad(w_down, ((0, 0), (0, Dp - D)))
        b_down = jnp.pad(b_down, ((0, 0), (0, Dp - D)))
        w_up = jnp.pad(w_up, ((0, Dp - D), (0, 0)))

    x2 = x.reshape(N, H)
    r2 = residual_input.reshape(N, H)

    row_spec = lambda w: pl.BlockSpec((TN, w), lambda i: (i, 0))   # tiled over rows

    out_shapes = [jax.ShapeDtypeStruct((N, H), out_dtype),
                  jax.ShapeDtypeStruct((N, Dp), out_dtype)]
    out_specs = [row_spec(H), row_spec(Dp)]
    if return_up:
        out_shapes.append(jax.ShapeDtypeStruct((N, H), out_dtype))
        out_specs.append(row_spec(H))

    est = _vmem_estimate(TN, H, Dp, act_b, w_b, n_h_out, weight_bufs)
    vmem_limit = int(min(max(est + (8 << 20), 32 << 20), vmem_cap - (4 << 20)))

    kernel = functools.partial(_adapter_kernel, n_rows=n_rows_arg)

    def _call(single_buffer_weights):
        def resident(shape):
            # Weights/biases never change across the grid -> keep resident; single-buffer
            # them so w_down/w_up are not duplicated in VMEM.
            if single_buffer_weights:
                return pl.BlockSpec(shape, lambda i: (0, 0),
                                    pipeline_mode=pl.Buffered(1))
            return pl.BlockSpec(shape, lambda i: (0, 0))

        return pl.pallas_call(
            kernel,
            grid=grid,
            out_shape=tuple(out_shapes),
            in_specs=[
                row_spec(H),           # x        (row-tiled, double-buffered)
                row_spec(H),           # residual
                resident((1, H)),      # ln weight
                resident((1, H)),      # ln bias
                resident((H, Dp)),     # w_down (in x out)
                resident((1, Dp)),     # b_down
                resident((Dp, H)),     # w_up   (in x out)
                resident((1, H)),      # b_up
            ],
            out_specs=tuple(out_specs),
            compiler_params=pltpu.CompilerParams(
                dimension_semantics=("parallel",),
                vmem_limit_bytes=vmem_limit,
            ),
        )(x2, r2, params["ln_w"], params["ln_b"], w_down, b_down, w_up, params["b_up"])

    try:
        outs = _call(_supports_buffered())
    except Exception:
        # Older jax without single-buffer pipeline_mode support: fall back to defaults.
        outs = _call(False)

    out = outs[0].reshape(B, S, H)
    down = outs[1][:, :D].reshape(B, S, D)
    up = outs[2].reshape(B, S, H) if return_up else None
    return out, down, up


def init_adapter_params(key, input_size, down_sample=None, dtype=jnp.bfloat16):
    """Matches Adapter.__init__ with init_bert_weights=True:
    Linear weights ~ N(0, 0.02), biases 0, LayerNorm weight=1, bias=0.
    bf16 default halves resident-weight VMEM / HBM traffic; pass jnp.float32 for full
    precision."""
    if down_sample is None:
        down_sample = input_size // 2
    down_sample = max(down_sample, 1)
    k1, k2 = jax.random.split(key)
    # Stored transposed relative to nn.Linear ((out,in) -> (in,out)) so the kernel
    # computes x @ W directly on the MXU.
    w_down = (0.02 * jax.random.normal(k1, (input_size, down_sample))).astype(dtype)
    w_up = (0.02 * jax.random.normal(k2, (down_sample, input_size))).astype(dtype)
    return {
        "ln_w": jnp.ones((1, input_size), dtype),
        "ln_b": jnp.zeros((1, input_size), dtype),
        "w_down": w_down,
        "b_down": jnp.zeros((1, down_sample), dtype),
        "w_up": w_up,
        "b_up": jnp.zeros((1, input_size), dtype),
    }


def adapter_reference(x, residual_input, params):
    """Pure-JAX reference mirroring the PyTorch forward."""
    xf = x.astype(jnp.float32)
    mean = jnp.mean(xf, axis=-1, keepdims=True)
    var = jnp.mean((xf - mean) ** 2, axis=-1, keepdims=True)
    xn = (xf - mean) / jnp.sqrt(var + 1e-5)
    xn = xn * params["ln_w"][0].astype(jnp.float32) + params["ln_b"][0].astype(jnp.float32)
    down = jnp.maximum(xn @ params["w_down"].astype(jnp.float32)
                       + params["b_down"][0].astype(jnp.float32), 0.0)
    up = down @ params["w_up"].astype(jnp.float32) + params["b_up"][0].astype(jnp.float32)
    out = up + residual_input.astype(jnp.float32)
    return out, down, up


if __name__ == "__main__":
    B, S, H = 2, 8, 32            # input_size = 32 -> down_sample = 16
    key = jax.random.PRNGKey(0)
    kx, kr, kp = jax.random.split(key, 3)

    x = jax.random.normal(kx, (B, S, H), jnp.float32)
    residual = jax.random.normal(kr, (B, S, H), jnp.float32)

    # 1) f32 params: tight numerical check against the pure-JAX reference (all 3 outputs).
    params_f32 = init_adapter_params(kp, H, dtype=jnp.float32)
    out, down, up = adapter_forward(x, residual, params_f32, return_up=True)
    jax.block_until_ready((out, down, up))
    ref_out, ref_down, ref_up = adapter_reference(x, residual, params_f32)
    assert jnp.allclose(out, ref_out, atol=1e-4, rtol=1e-4)
    assert jnp.allclose(down, ref_down, atol=1e-4, rtol=1e-4)
    assert jnp.allclose(up, ref_up, atol=1e-4, rtol=1e-4)

    # 2) Fast path: default bf16 weights, no `up` HBM writeback.
    params_bf16 = init_adapter_params(kp, H)           # dtype defaults to bfloat16
    out_b, down_b, up_b = adapter_forward(x, residual, params_bf16)   # return_up=False
    jax.block_until_ready((out_b, down_b))
    ref_out_b, ref_down_b, _ = adapter_reference(x, residual, params_bf16)
    assert up_b is None
    assert jnp.allclose(out_b, ref_out_b, atol=3e-2, rtol=3e-2)
    assert jnp.allclose(down_b, ref_down_b, atol=3e-2, rtol=3e-2)

    print("KERNEL_OK")
</pallas_src>

<mosaic_0001>
module attributes {stable_mosaic.version = 11 : i64} {
  func.func @_adapter_kernel(%arg0: i32, %arg1: memref<16x32xf32, #tpu.memory_space<vmem>>, %arg2: memref<16x32xf32, #tpu.memory_space<vmem>>, %arg3: memref<1x32xf32, #tpu.memory_space<vmem>>, %arg4: memref<1x32xf32, #tpu.memory_space<vmem>>, %arg5: memref<32x128xf32, #tpu.memory_space<vmem>>, %arg6: memref<1x128xf32, #tpu.memory_space<vmem>>, %arg7: memref<128x32xf32, #tpu.memory_space<vmem>>, %arg8: memref<1x32xf32, #tpu.memory_space<vmem>>, %arg9: memref<16x32xf32, #tpu.memory_space<vmem>>, %arg10: memref<16x128xf32, #tpu.memory_space<vmem>>, %arg11: memref<16x32xf32, #tpu.memory_space<vmem>>) attributes {dimension_semantics = [#tpu.dimension_semantics<parallel>], iteration_bounds = array<i64: 1>, scalar_prefetch = 0 : i64, scratch_operands = 0 : i64, tpu.core_type = #tpu.core_type<tc>, window_params = [{transform_indices = @transform_0, window_bounds = array<i64: 16, 32>}, {transform_indices = @transform_1, window_bounds = array<i64: 16, 32>}, {pipeline_mode = #tpu.pipeline_mode<synchronous>, transform_indices = @transform_2, window_bounds = array<i64: 1, 32>}, {pipeline_mode = #tpu.pipeline_mode<synchronous>, transform_indices = @transform_3, window_bounds = array<i64: 1, 32>}, {pipeline_mode = #tpu.pipeline_mode<synchronous>, transform_indices = @transform_4, window_bounds = array<i64: 32, 128>}, {pipeline_mode = #tpu.pipeline_mode<synchronous>, transform_indices = @transform_5, window_bounds = array<i64: 1, 128>}, {pipeline_mode = #tpu.pipeline_mode<synchronous>, transform_indices = @transform_6, window_bounds = array<i64: 128, 32>}, {pipeline_mode = #tpu.pipeline_mode<synchronous>, transform_indices = @transform_7, window_bounds = array<i64: 1, 32>}, {transform_indices = @transform_8, window_bounds = array<i64: 16, 32>}, {transform_indices = @transform_9, window_bounds = array<i64: 16, 128>}, {transform_indices = @transform_10, window_bounds = array<i64: 16, 32>}]} {
    %c0 = arith.constant 0 : index
    %c0_0 = arith.constant 0 : index
    %0 = vector.load %arg1[%c0, %c0_0] : memref<16x32xf32, #tpu.memory_space<vmem>>, vector<16x32xf32>
    %cst = arith.constant dense<0.000000e+00> : vector<16xf32>
    %1 = vector.multi_reduction <add>, %0, %cst [1] : vector<16x32xf32> to vector<16xf32>
    %2 = vector.shape_cast %1 : vector<16xf32> to vector<16x1xf32>
    %cst_1 = arith.constant 3.125000e-02 : f32
    %3 = vector.broadcast %cst_1 : f32 to vector<16x1xf32>
    %4 = arith.mulf %2, %3 : vector<16x1xf32>
    %5 = vector.broadcast %4 : vector<16x1xf32> to vector<16x32xf32>
    %6 = arith.subf %0, %5 : vector<16x32xf32>
    %7 = arith.mulf %6, %6 : vector<16x32xf32>
    %cst_2 = arith.constant dense<0.000000e+00> : vector<16xf32>
    %8 = vector.multi_reduction <add>, %7, %cst_2 [1] : vector<16x32xf32> to vector<16xf32>
    %9 = vector.shape_cast %8 : vector<16xf32> to vector<16x1xf32>
    %cst_3 = arith.constant 3.125000e-02 : f32
    %10 = vector.broadcast %cst_3 : f32 to vector<16x1xf32>
    %11 = arith.mulf %9, %10 : vector<16x1xf32>
    %cst_4 = arith.constant 9.99999974E-6 : f32
    %12 = vector.broadcast %cst_4 : f32 to vector<16x1xf32>
    %13 = arith.addf %11, %12 : vector<16x1xf32>
    %14 = math.rsqrt %13 : vector<16x1xf32>
    %15 = vector.broadcast %14 : vector<16x1xf32> to vector<16x32xf32>
    %16 = arith.mulf %6, %15 : vector<16x32xf32>
    %c0_5 = arith.constant 0 : index
    %c0_6 = arith.constant 0 : index
    %17 = vector.load %arg3[%c0_5, %c0_6] : memref<1x32xf32, #tpu.memory_space<vmem>>, vector<1x32xf32>
    %18 = vector.broadcast %17 : vector<1x32xf32> to vector<16x32xf32>
    %19 = arith.mulf %16, %18 : vector<16x32xf32>
    %c0_7 = arith.constant 0 : index
    %c0_8 = arith.constant 0 : index
    %20 = vector.load %arg4[%c0_7, %c0_8] : memref<1x32xf32, #tpu.memory_space<vmem>>, vector<1x32xf32>
    %21 = vector.broadcast %20 : vector<1x32xf32> to vector<16x32xf32>
    %22 = arith.addf %19, %21 : vector<16x32xf32>
    %c0_9 = arith.constant 0 : index
    %c0_10 = arith.constant 0 : index
    %23 = vector.load %arg5[%c0_9, %c0_10] : memref<32x128xf32, #tpu.memory_space<vmem>>, vector<32x128xf32>
    %cst_11 = arith.constant dense<0.000000e+00> : vector<16x128xf32>
    %24 = tpu.matmul %22, %23, %cst_11 {dimension_numbers = #tpu.dot_dimension_numbers<[1], [0], [0], [1], [0, 0, 1, 1], [], []>} : vector<16x32xf32>, vector<32x128xf32>, vector<16x128xf32> -> vector<16x128xf32>
    %c0_12 = arith.constant 0 : index
    %c0_13 = arith.constant 0 : index
    %25 = vector.load %arg6[%c0_12, %c0_13] : memref<1x128xf32, #tpu.memory_space<vmem>>, vector<1x128xf32>
    %26 = vector.broadcast %25 : vector<1x128xf32> to vector<16x128xf32>
    %27 = arith.addf %24, %26 : vector<16x128xf32>
    %cst_14 = arith.constant 0.000000e+00 : f32
    %28 = vector.broadcast %cst_14 : f32 to vector<16x128xf32>
    %29 = arith.maximumf %27, %28 : vector<16x128xf32>
    %c0_15 = arith.constant 0 : index
    %c0_16 = arith.constant 0 : index
    %30 = vector.load %arg7[%c0_15, %c0_16] : memref<128x32xf32, #tpu.memory_space<vmem>>, vector<128x32xf32>
    %cst_17 = arith.constant dense<0.000000e+00> : vector<16x32xf32>
    %31 = tpu.matmul %29, %30, %cst_17 {dimension_numbers = #tpu.dot_dimension_numbers<[1], [0], [0], [1], [0, 0, 1, 1], [], []>} : vector<16x128xf32>, vector<128x32xf32>, vector<16x32xf32> -> vector<16x32xf32>
    %c0_18 = arith.constant 0 : index
    %c0_19 = arith.constant 0 : index
    %32 = vector.load %arg8[%c0_18, %c0_19] : memref<1x32xf32, #tpu.memory_space<vmem>>, vector<1x32xf32>
    %33 = vector.broadcast %32 : vector<1x32xf32> to vector<16x32xf32>
    %34 = arith.addf %31, %33 : vector<16x32xf32>
    %c0_20 = arith.constant 0 : index
    %c0_21 = arith.constant 0 : index
    %35 = vector.load %arg2[%c0_20, %c0_21] : memref<16x32xf32, #tpu.memory_space<vmem>>, vector<16x32xf32>
    %36 = arith.addf %34, %35 : vector<16x32xf32>
    %c0_22 = arith.constant 0 : index
    %c0_23 = arith.constant 0 : index
    %37 = vector.load %arg9[%c0_22, %c0_23] : memref<16x32xf32, #tpu.memory_space<vmem>>, vector<16x32xf32>
    tpu.vector_store %arg9[%c0_22, %c0_23], %36 {strides = array<i32>} : memref<16x32xf32, #tpu.memory_space<vmem>>, vector<16x32xf32>,
    %c0_24 = arith.constant 0 : index
    %c0_25 = arith.constant 0 : index
    %38 = vector.load %arg10[%c0_24, %c0_25] : memref<16x128xf32, #tpu.memory_space<vmem>>, vector<16x128xf32>
    tpu.vector_store %arg10[%c0_24, %c0_25], %29 {strides = array<i32>} : memref<16x128xf32, #tpu.memory_space<vmem>>, vector<16x128xf32>,
    %c0_26 = arith.constant 0 : index
    %c0_27 = arith.constant 0 : index
    %39 = vector.load %arg11[%c0_26, %c0_27] : memref<16x32xf32, #tpu.memory_space<vmem>>, vector<16x32xf32>
    tpu.vector_store %arg11[%c0_26, %c0_27], %34 {strides = array<i32>} : memref<16x32xf32, #tpu.memory_space<vmem>>, vector<16x32xf32>,
    return
  }
  func.func @transform_0(%arg0: i32) -> (i32, i32) {
    %c0_i32 = arith.constant 0 : i32
    %c0_i32_0 = arith.constant 0 : i32
    return %arg0, %c0_i32 : i32, i32
  }
  func.func @transform_1(%arg0: i32) -> (i32, i32) {
    %c0_i32 = arith.constant 0 : i32
    %c0_i32_0 = arith.constant 0 : i32
    return %arg0, %c0_i32 : i32, i32
  }
  func.func @transform_2(%arg0: i32) -> (i32, i32) {
    %c0_i32 = arith.constant 0 : i32
    %c0_i32_0 = arith.constant 0 : i32
    %c0_i32_1 = arith.constant 0 : i32
    return %c0_i32, %c0_i32_0 : i32, i32
  }
  func.func @transform_3(%arg0: i32) -> (i32, i32) {
    %c0_i32 = arith.constant 0 : i32
    %c0_i32_0 = arith.constant 0 : i32
    %c0_i32_1 = arith.constant 0 : i32
    return %c0_i32, %c0_i32_0 : i32, i32
  }
  func.func @transform_4(%arg0: i32) -> (i32, i32) {
    %c0_i32 = arith.constant 0 : i32
    %c0_i32_0 = arith.constant 0 : i32
    %c0_i32_1 = arith.constant 0 : i32
    return %c0_i32, %c0_i32_0 : i32, i32
  }
  func.func @transform_5(%arg0: i32) -> (i32, i32) {
    %c0_i32 = arith.constant 0 : i32
    %c0_i32_0 = arith.constant 0 : i32
    %c0_i32_1 = arith.constant 0 : i32
    return %c0_i32, %c0_i32_0 : i32, i32
  }
  func.func @transform_6(%arg0: i32) -> (i32, i32) {
    %c0_i32 = arith.constant 0 : i32
    %c0_i32_0 = arith.constant 0 : i32
    %c0_i32_1 = arith.constant 0 : i32
    return %c0_i32, %c0_i32_0 : i32, i32
  }
  func.func @transform_7(%arg0: i32) -> (i32, i32) {
    %c0_i32 = arith.constant 0 : i32
    %c0_i32_0 = arith.constant 0 : i32
    %c0_i32_1 = arith.constant 0 : i32
    return %c0_i32, %c0_i32_0 : i32, i32
  }
  func.func @transform_8(%arg0: i32) -> (i32, i32) {
    %c0_i32 = arith.constant 0 : i32
    %c0_i32_0 = arith.constant 0 : i32
    return %arg0, %c0_i32 : i32, i32
  }
  func.func @transform_9(%arg0: i32) -> (i32, i32) {
    %c0_i32 = arith.constant 0 : i32
    %c0_i32_0 = arith.constant 0 : i32
    return %arg0, %c0_i32 : i32, i32
  }
  func.func @transform_10(%arg0: i32) -> (i32, i32) {
    %c0_i32 = arith.constant 0 : i32
    %c0_i32_0 = arith.constant 0 : i32
    return %arg0, %c0_i32 : i32, i32
  }
}

module attributes {stable_mosaic.version = 11 : i64} {
  func.func @_adapter_kernel(%arg0: i32, %arg1: memref<16x32xf32, #tpu.memory_space<vmem>>, %arg2: memref<16x32xf32, #tpu.memory_space<vmem>>, %arg3: memref<1x32xf32, #tpu.memory_space<vmem>>, %arg4: memref<1x32xf32, #tpu.memory_space<vmem>>, %arg5: memref<32x128xf32, #tpu.memory_space<vmem>>, %arg6: memref<1x128xf32, #tpu.memory_space<vmem>>, %arg7: memref<128x32xf32, #tpu.memory_space<vmem>>, %arg8: memref<1x32xf32, #tpu.memory_space<vmem>>, %arg9: memref<16x32xf32, #tpu.memory_space<vmem>>, %arg10: memref<16x128xf32, #tpu.memory_space<vmem>>, %arg11: memref<16x32xf32, #tpu.memory_space<vmem>>) attributes {dimension_semantics = [#tpu.dimension_semantics<parallel>], iteration_bounds = array<i64: 1>, scalar_prefetch = 0 : i64, scratch_operands = 0 : i64, tpu.core_type = #tpu.core_type<tc>, window_params = [{transform_indices = @transform_0, window_bounds = array<i64: 16, 32>}, {transform_indices = @transform_1, window_bounds = array<i64: 16, 32>}, {pipeline_mode = #tpu.pipeline_mode<synchronous>, transform_indices = @transform_2, window_bounds = array<i64: 1, 32>}, {pipeline_mode = #tpu.pipeline_mode<synchronous>, transform_indices = @transform_3, window_bounds = array<i64: 1, 32>}, {pipeline_mode = #tpu.pipeline_mode<synchronous>, transform_indices = @transform_4, window_bounds = array<i64: 32, 128>}, {pipeline_mode = #tpu.pipeline_mode<synchronous>, transform_indices = @transform_5, window_bounds = array<i64: 1, 128>}, {pipeline_mode = #tpu.pipeline_mode<synchronous>, transform_indices = @transform_6, window_bounds = array<i64: 128, 32>}, {pipeline_mode = #tpu.pipeline_mode<synchronous>, transform_indices = @transform_7, window_bounds = array<i64: 1, 32>}, {transform_indices = @transform_8, window_bounds = array<i64: 16, 32>}, {transform_indices = @transform_9, window_bounds = array<i64: 16, 128>}, {transform_indices = @transform_10, window_bounds = array<i64: 16, 32>}]} {
    %c0 = arith.constant 0 : index
    %c0_0 = arith.constant 0 : index
    %0 = vector.load %arg1[%c0, %c0_0] : memref<16x32xf32, #tpu.memory_space<vmem>>, vector<16x32xf32>
    %cst = arith.constant dense<0.000000e+00> : vector<16xf32>
    %1 = vector.multi_reduction <add>, %0, %cst [1] : vector<16x32xf32> to vector<16xf32>
    %2 = vector.shape_cast %1 : vector<16xf32> to vector<16x1xf32>
    %cst_1 = arith.constant 3.125000e-02 : f32
    %3 = vector.broadcast %cst_1 : f32 to vector<16x1xf32>
    %4 = arith.mulf %2, %3 : vector<16x1xf32>
    %5 = vector.broadcast %4 : vector<16x1xf32> to vector<16x32xf32>
    %6 = arith.subf %0, %5 : vector<16x32xf32>
    %7 = arith.mulf %6, %6 : vector<16x32xf32>
    %cst_2 = arith.constant dense<0.000000e+00> : vector<16xf32>
    %8 = vector.multi_reduction <add>, %7, %cst_2 [1] : vector<16x32xf32> to vector<16xf32>
    %9 = vector.shape_cast %8 : vector<16xf32> to vector<16x1xf32>
    %cst_3 = arith.constant 3.125000e-02 : f32
    %10 = vector.broadcast %cst_3 : f32 to vector<16x1xf32>
    %11 = arith.mulf %9, %10 : vector<16x1xf32>
    %cst_4 = arith.constant 9.99999974E-6 : f32
    %12 = vector.broadcast %cst_4 : f32 to vector<16x1xf32>
    %13 = arith.addf %11, %12 : vector<16x1xf32>
    %14 = math.rsqrt %13 : vector<16x1xf32>
    %15 = vector.broadcast %14 : vector<16x1xf32> to vector<16x32xf32>
    %16 = arith.mulf %6, %15 : vector<16x32xf32>
    %c0_5 = arith.constant 0 : index
    %c0_6 = arith.constant 0 : index
    %17 = vector.load %arg3[%c0_5, %c0_6] : memref<1x32xf32, #tpu.memory_space<vmem>>, vector<1x32xf32>
    %18 = vector.broadcast %17 : vector<1x32xf32> to vector<16x32xf32>
    %19 = arith.mulf %16, %18 : vector<16x32xf32>
    %c0_7 = arith.constant 0 : index
    %c0_8 = arith.constant 0 : index
    %20 = vector.load %arg4[%c0_7, %c0_8] : memref<1x32xf32, #tpu.memory_space<vmem>>, vector<1x32xf32>
    %21 = vector.broadcast %20 : vector<1x32xf32> to vector<16x32xf32>
    %22 = arith.addf %19, %21 : vector<16x32xf32>
    %c0_9 = arith.constant 0 : index
    %c0_10 = arith.constant 0 : index
    %23 = vector.load %arg5[%c0_9, %c0_10] : memref<32x128xf32, #tpu.memory_space<vmem>>, vector<32x128xf32>
    %cst_11 = arith.constant dense<0.000000e+00> : vector<16x128xf32>
    %24 = tpu.matmul %22, %23, %cst_11 {dimension_numbers = #tpu.dot_dimension_numbers<[1], [0], [0], [1], [0, 0, 1, 1], [], []>} : vector<16x32xf32>, vector<32x128xf32>, vector<16x128xf32> -> vector<16x128xf32>
    %c0_12 = arith.constant 0 : index
    %c0_13 = arith.constant 0 : index
    %25 = vector.load %arg6[%c0_12, %c0_13] : memref<1x128xf32, #tpu.memory_space<vmem>>, vector<1x128xf32>
    %26 = vector.broadcast %25 : vector<1x128xf32> to vector<16x128xf32>
    %27 = arith.addf %24, %26 : vector<16x128xf32>
    %cst_14 = arith.constant 0.000000e+00 : f32
    %28 = vector.broadcast %cst_14 : f32 to vector<16x128xf32>
    %29 = arith.maximumf %27, %28 : vector<16x128xf32>
    %c0_15 = arith.constant 0 : index
    %c0_16 = arith.constant 0 : index
    %30 = vector.load %arg7[%c0_15, %c0_16] : memref<128x32xf32, #tpu.memory_space<vmem>>, vector<128x32xf32>
    %cst_17 = arith.constant dense<0.000000e+00> : vector<16x32xf32>
    %31 = tpu.matmul %29, %30, %cst_17 {dimension_numbers = #tpu.dot_dimension_numbers<[1], [0], [0], [1], [0, 0, 1, 1], [], []>} : vector<16x128xf32>, vector<128x32xf32>, vector<16x32xf32> -> vector<16x32xf32>
    %c0_18 = arith.constant 0 : index
    %c0_19 = arith.constant 0 : index
    %32 = vector.load %arg8[%c0_18, %c0_19] : memref<1x32xf32, #tpu.memory_space<vmem>>, vector<1x32xf32>
    %33 = vector.broadcast %32 : vector<1x32xf32> to vector<16x32xf32>
    %34 = arith.addf %31, %33 : vector<16x32xf32>
    %c0_20 = arith.constant 0 : index
    %c0_21 = arith.constant 0 : index
    %35 = vector.load %arg2[%c0_20, %c0_21] : memref<16x32xf32, #tpu.memory_space<vmem>>, vector<16x32xf32>
    %36 = arith.addf %34, %35 : vector<16x32xf32>
    %c0_22 = arith.constant 0 : index
    %c0_23 = arith.constant 0 : index
    %37 = vector.load %arg9[%c0_22, %c0_23] : memref<16x32xf32, #tpu.memory_space<vmem>>, vector<16x32xf32>
    tpu.vector_store %arg9[%c0_22, %c0_23], %36 {strides = array<i32>} : memref<16x32xf32, #tpu.memory_space<vmem>>, vector<16x32xf32>,
    %c0_24 = arith.constant 0 : index
    %c0_25 = arith.constant 0 : index
    %38 = vector.load %arg10[%c0_24, %c0_25] : memref<16x128xf32, #tpu.memory_space<vmem>>, vector<16x128xf32>
    tpu.vector_store %arg10[%c0_24, %c0_25], %29 {strides = array<i32>} : memref<16x128xf32, #tpu.memory_space<vmem>>, vector<16x128xf32>,
    %c0_26 = arith.constant 0 : index
    %c0_27 = arith.constant 0 : index
    %39 = vector.load %arg11[%c0_26, %c0_27] : memref<16x32xf32, #tpu.memory_space<vmem>>, vector<16x32xf32>
    tpu.vector_store %arg11[%c0_26, %c0_27], %34 {strides = array<i32>} : memref<16x32xf32, #tpu.memory_space<vmem>>, vector<16x32xf32>,
    return
  }
  func.func @transform_0(%arg0: i32) -> (i32, i32) {
    %c0_i32 = arith.constant 0 : i32
    %c0_i32_0 = arith.constant 0 : i32
    return %arg0, %c0_i32 : i32, i32
  }
  func.func @transform_1(%arg0: i32) -> (i32, i32) {
    %c0_i32 = arith.constant 0 : i32
    %c0_i32_0 = arith.constant 0 : i32
    return %arg0, %c0_i32 : i32, i32
  }
  func.func @transform_2(%arg0: i32) -> (i32, i32) {
    %c0_i32 = arith.constant 0 : i32
    %c0_i32_0 = arith.constant 0 : i32
    %c0_i32_1 = arith.constant 0 : i32
    return %c0_i32, %c0_i32_0 : i32, i32
  }
  func.func @transform_3(%arg0: i32) -> (i32, i32) {
    %c0_i32 = arith.constant 0 : i32
    %c0_i32_0 = arith.constant 0 : i32
    %c0_i32_1 = arith.constant 0 : i32
    return %c0_i32, %c0_i32_0 : i32, i32
  }
  func.func @transform_4(%arg0: i32) -> (i32, i32) {
    %c0_i32 = arith.constant 0 : i32
    %c0_i32_0 = arith.constant 0 : i32
    %c0_i32_1 = arith.constant 0 : i32
    return %c0_i32, %c0_i32_0 : i32, i32
  }
  func.func @transform_5(%arg0: i32) -> (i32, i32) {
    %c0_i32 = arith.constant 0 : i32
    %c0_i32_0 = arith.constant 0 : i32
    %c0_i32_1 = arith.constant 0 : i32
    return %c0_i32, %c0_i32_0 : i32, i32
  }
  func.func @transform_6(%arg0: i32) -> (i32, i32) {
    %c0_i32 = arith.constant 0 : i32
    %c0_i32_0 = arith.constant 0 : i32
    %c0_i32_1 = arith.constant 0 : i32
    return %c0_i32, %c0_i32_0 : i32, i32
  }
  func.func @transform_7(%arg0: i32) -> (i32, i32) {
    %c0_i32 = arith.constant 0 : i32
    %c0_i32_0 = arith.constant 0 : i32
    %c0_i32_1 = arith.constant 0 : i32
    return %c0_i32, %c0_i32_0 : i32, i32
  }
  func.func @transform_8(%arg0: i32) -> (i32, i32) {
    %c0_i32 = arith.constant 0 : i32
    %c0_i32_0 = arith.constant 0 : i32
    return %arg0, %c0_i32 : i32, i32
  }
  func.func @transform_9(%arg0: i32) -> (i32, i32) {
    %c0_i32 = arith.constant 0 : i32
    %c0_i32_0 = arith.constant 0 : i32
    return %arg0, %c0_i32 : i32, i32
  }
  func.func @transform_10(%arg0: i32) -> (i32, i32) {
    %c0_i32 = arith.constant 0 : i32
    %c0_i32_0 = arith.constant 0 : i32
    return %arg0, %c0_i32 : i32, i32
  }
}

</mosaic_0001>

<bundles_post_ra>
// kernel: tpu_custom_call.1
= control target key start
LH: loop header
LB: loop body
LE: loop exit
PB: predicated region body
PF: predicated region fallthrough
CT: control target
= control target key end

     0   :  { %16 = vsyncpa [#allocation3], 0  ;;  %vm36_vm0 = vcmask 261120   ;;  %s527_s0 = inlined_call_operand.vmem [shape: f32[16,32], index: 0, kind: input, shape index: {}]   ;;  %s528_s1 = inlined_call_operand.vmem [shape: f32[16,32], index: 1, kind: input, shape index: {}]   ;;  %s529_s2 = inlined_call_operand.vmem [shape: f32[1,32], index: 2, kind: input, shape index: {}]   ;;  %s530_s3 = inlined_call_operand.vmem [shape: f32[1,32], index: 3, kind: input, shape index: {}]   ;;  %s531_s4 = inlined_call_operand.vmem [shape: f32[32,128], index: 4, kind: input, shape index: {}]   ;;  %s532_s5 = inlined_call_operand.vmem [shape: f32[1,128], index: 5, kind: input, shape index: {}]   ;;  %s533_s6 = inlined_call_operand.vmem [shape: f32[128,32], index: 6, kind: input, shape index: {}]   ;;  %s534_s7 = inlined_call_operand.vmem [shape: f32[1,32], index: 7, kind: input, shape index: {}]   ;;  %s535_s8 = inlined_call_operand.hbm [shape: f32[16,32], index: 8, kind: output, shape index: {0}]   ;;  %s536_s9 = inlined_call_operand.hbm [shape: f32[16,128], index: 9, kind: output, shape index: {1}]   ;;  %s537_s10 = inlined_call_operand.hbm [shape: f32[16,32], index: 10, kind: output, shape index: {2}]  }
   0x1   :  { %v34_v0 = vld [vmem:[%s527_s0] sm:$0xff] }
   0x2   :  { %v37_v1 = vsel %vm36_vm0, %v34_v0, 0.0 }
   0x3   :  { %38 = vadd.xlane.f32.xlu0 %v37_v1 }
   0x4   :  { %17 = vsyncpa [#allocation5], 0  ;;  %v35_v2 = vld [vmem:[%s527_s0 + $0x8] sm:$0xff]  ;;  %v96_v14 = vld [vmem:[%s531_s4 + $0x18] sm:$0xff]  ;;  %s345_s0 = smov [#allocation4]   ;;  %s204_s19 = sshll.u32 %s536_s9, 4  ;;  %s205_s19 = int_to_ptr.hbm [resolvable:$true] %s204_s19 }
   0x5   :  { %v40_v3 = vsel %vm36_vm0, %v35_v2, 0.0  ;;  %119 = vmatpush.msra.mxu0 %v96_v14  ;;  %v95_v15 = vld [vmem:[%s531_s4 + $0x10] sm:$0xff]  ;;  %v94_v16 = vld [vmem:[%s531_s4 + $0x8] sm:$0xff]  ;;  %v93_v17 = vld [vmem:[%s531_s4] sm:$0xff]  ;;  %s202_s17 = sshll.u32 %s345_s0, 4  ;;  %s346_s20 = smov 128   ;;  %s203_s17 = int_to_ptr.vmem [resolvable:$true] %s202_s17 }
   0x6   :  { %v147_v21 = vld [vmem:[%s533_s6 + $0x78] sm:$0xff]  ;;  %v146_v22 = vld [vmem:[%s533_s6 + $0x70] sm:$0xff]  ;;  %v145_v23 = vld [vmem:[%s533_s6 + $0x68] sm:$0xff]  ;;  %s348_s9 = smov [#allocation6]   ;;  %s349_s29 = smov [#allocation2]  }
   0x7   :  { %120 = vmatpush.msra.mxu0 %v95_v15  ;;  %152 = vmatpush.msra.mxu1 %v147_v21  ;;  %v144_v26 = vld [vmem:[%s533_s6 + $0x60] sm:$0xff]  ;;  %v143_v29 = vld [vmem:[%s533_s6 + $0x58] sm:$0xff]  ;;  %v142_v31 = vld [vmem:[%s533_s6 + $0x50] sm:$0xff]  ;;  %s215_s25 = sshll.u32 %s348_s9, 4  ;;  %s189_s4 = sshll.u32 %s349_s29, 4  ;;  %s216_s25 = int_to_ptr.vmem [resolvable:$true] %s215_s25  ;;  %s190_s4 = int_to_ptr.vmem [resolvable:$true] %s189_s4 }
   0x8   :  { %240 = vmatpush.msra.mxu2 %v147_v21  ;;  %v141_v33 = vld [vmem:[%s533_s6 + $0x48] sm:$0xff]  ;;  %v140_v35 = vld [vmem:[%s533_s6 + $0x40] sm:$0xff]  ;;  %v139_v38 = vld [vmem:[%s533_s6 + $0x38] sm:$0xff]  ;;  %s191_s11 = sshll.u32 %s535_s8, 4  ;;  %s192_s11 = int_to_ptr.hbm [resolvable:$true] %s191_s11 }
   0x9   :  { %121 = vmatpush.msra.mxu0 %v94_v16  ;;  %153 = vmatpush.msra.mxu1 %v146_v22  ;;  %v261_v41 = vld [vmem:[%s529_s2] ss:$0 sm:$0xff]  ;;  %v138_v42 = vld [vmem:[%s533_s6 + $0x30] sm:$0xff]  ;;  %v137_v47 = vld [vmem:[%s533_s6 + $0x28] sm:$0xff]  ;;  %s217_s2 = sshll.u32 %s537_s10, 4  ;;  %s218_s2 = int_to_ptr.hbm [resolvable:$true] %s217_s2 }
   0xa   :  { %241 = vmatpush.msra.mxu2 %v146_v22  ;;  %v262_v46 = vld [vmem:[%s530_s3] ss:$0 sm:$0xff]  ;;  %v135_v53 = vld [vmem:[%s533_s6 + $0x18] sm:$0xff]  ;;  %v134_v59 = vld [vmem:[%s533_s6 + $0x10] sm:$0xff] }
   0xb   :  { %41 = vadd.xlane.f32.xlu0 %v40_v3  ;;  %122 = vmatpush.msra.mxu0 %v93_v17  ;;  %v136_v50 = vld [vmem:[%s533_s6 + $0x20] sm:$0xff]  ;;  %v133_v60 = vld [vmem:[%s533_s6 + $0x8] sm:$0xff] }
   0xc   :  { %154 = vmatpush.msra.mxu1 %v145_v23  ;;  %242 = vmatpush.msra.mxu2 %v145_v23  ;;  %v132_v61 = vld [vmem:[%s533_s6] sm:$0xff] }
   0xd   :  { %v263_v62 = vld [vmem:[%s532_s5] ss:$0 sm:$0xff]  ;;  %s347_s5 = smov 8  }
   0xe   :  { %155 = vmatpush.msra.mxu1 %v144_v26  ;;  %243 = vmatpush.msra.mxu2 %v144_v26 }
  0x10   :  { %156 = vmatpush.msra.mxu1 %v143_v29  ;;  %244 = vmatpush.msra.mxu2 %v143_v29 }
  0x12   :  { %157 = vmatpush.msra.mxu1 %v142_v31  ;;  %245 = vmatpush.msra.mxu2 %v142_v31 }
  0x14   :  { %158 = vmatpush.msra.mxu1 %v141_v33  ;;  %246 = vmatpush.msra.mxu2 %v141_v33 }
  0x16   :  { %159 = vmatpush.msra.mxu1 %v140_v35  ;;  %247 = vmatpush.msra.mxu2 %v140_v35 }
  0x18   :  { %160 = vmatpush.msra.mxu1 %v139_v38  ;;  %248 = vmatpush.msra.mxu2 %v139_v38 }
  0x1a   :  { %161 = vmatpush.msra.mxu1 %v138_v42  ;;  %249 = vmatpush.msra.mxu2 %v138_v42 }
  0x1c   :  { %162 = vmatpush.msra.mxu1 %v137_v47  ;;  %250 = vmatpush.msra.mxu2 %v137_v47 }
  0x1e   :  { %163 = vmatpush.msra.mxu1 %v136_v50  ;;  %251 = vmatpush.msra.mxu2 %v136_v50 }
  0x20   :  { %164 = vmatpush.msra.mxu1 %v135_v53  ;;  %252 = vmatpush.msra.mxu2 %v135_v53 }
  0x22   :  { %165 = vmatpush.msra.mxu1 %v134_v59  ;;  %253 = vmatpush.msra.mxu2 %v134_v59 }
  0x24   :  { %166 = vmatpush.msra.mxu1 %v133_v60  ;;  %254 = vmatpush.msra.mxu2 %v133_v60 }
  0x26   :  { %167 = vmatpush.msra.mxu1 %v132_v61  ;;  %255 = vmatpush.msra.mxu2 %v132_v61 }
  0x76   :  { %v39_v4 = vpop.xlane.xlu0 %38 }
  0x77   :  { %v43_v5 = vmul.f32 0.03125, %v39_v4 }
  0x79   :  { %v413_v6 = vsub.f32 %v34_v0, %v43_v5  ;;  %v264_v5 = vld [vmem:[%s534_s7] ss:$0 sm:$0xff] }
  0x7b   :  { %v47_v7 = vmul.f32 %v413_v6, %v413_v6 }
  0x7d   :  { %v49_v8 = vsel %vm36_vm0, %v47_v7, 0.0  ;;  %v175_v7 = vld [vmem:[%s528_s1] sm:$0xff] }
  0x7e   :  { %50 = vadd.xlane.f32.xlu1 %v49_v8  ;;  %v42_v9 = vpop.xlane.xlu0 %41 }
  0x7f   :  { %v44_v10 = vmul.f32 0.03125, %v42_v9 }
  0x81   :  { %v418_v11 = vsub.f32 %v35_v2, %v44_v10 }
  0x83   :  { %v48_v12 = vmul.f32 %v418_v11, %v418_v11 }
  0x85   :  { %v52_v13 = vsel %vm36_vm0, %v48_v12, 0.0 }
  0x86   :  { %53 = vadd.xlane.f32.xlu1 %v52_v13 }
  0xf1   :  { %v51_v18 = vpop.xlane.xlu1 %50 }
  0xf2   :  { %v55_v19 = vmul.f32 0.03125, %v51_v18 }
  0xf4   :  { %v57_v20 = vadd.f32 1e-05, %v55_v19 }
  0xf6   :  { %265 = vrsqrt.f32 %v57_v20  ;;  %vm65_vm2 = vweird.f32 %v57_v20 }
  0xf9   :  { %v54_v24 = vpop.xlane.xlu1 %53 }
  0xfa   :  { %v56_v25 = vmul.f32 0.03125, %v54_v24 }
  0xfc   :  { %v266_v27 = vpop.eup %265  ;;  %v58_v28 = vadd.f32 1e-05, %v56_v25 }
  0xfd   :  { %v60_v30 = vmul.f32 %v266_v27, %v57_v20  ;;  %vm66_vm1 = vweird.f32 %v266_v27 }
  0xfe   :  { %267 = vrsqrt.f32 %v58_v28  ;;  %vm67_vm3 = vmor %vm65_vm2, %vm66_vm1  ;;  %vm75_vm5 = vweird.f32 %v58_v28 }
  0xff   :  { %v61_v32 = vmul.f32 %v266_v27, %v60_v30 }
 0x101   :  { %v62_v34 = vmul.f32 0.5, %v61_v32 }
 0x103   :  { %v63_v36 = vsub.f32 1.5, %v62_v34 }
 0x104   :  { %v268_v37 = vpop.eup %267 }
 0x105   :  { %v64_v39 = vmul.f32 %v266_v27, %v63_v36  ;;  %v70_v40 = vmul.f32 %v268_v37, %v58_v28  ;;  %vm76_vm4 = vweird.f32 %v268_v37 }
 0x106   :  { %vm77_vm6 = vmor %vm75_vm5, %vm76_vm4 }
 0x107   :  { %v68_v43 = vsel %vm67_vm3, %v266_v27, %v64_v39  ;;  %v71_v44 = vmul.f32 %v268_v37, %v70_v40 }
 0x108   :  { %v79_v45 = vmul.f32 %v68_v43, %v413_v6 }
 0x109   :  { %v72_v48 = vmul.f32 0.5, %v71_v44 }
 0x10a   :  { %v85_v49 = vmul.f32 %v261_v41, %v79_v45 }
 0x10b   :  { %v73_v51 = vsub.f32 1.5, %v72_v48 }
 0x10c   :  { %v91_v52 = vadd.f32 %v262_v46, %v85_v49 }
 0x10d   :  { %v74_v54 = vmul.f32 %v268_v37, %v73_v51 }
 0x10e   :  { %238 = vmatmul.msk.f32.vlgmr.msra.gmra.mxu0 %vm36_vm0, %v91_v52 }
 0x10f   :  { %v78_v55 = vsel %vm77_vm6, %v268_v37, %v74_v54 }
 0x110   :  { %v80_v56 = vmul.f32 %v78_v55, %v418_v11  ;;  %v176_v11 = vld [vmem:[%s528_s1 + $0x8] sm:$0xff] }
 0x112   :  { %v86_v57 = vmul.f32 %v261_v41, %v80_v56 }
 0x114   :  { %v92_v58 = vadd.f32 %v262_v46, %v86_v57 }
 0x116   :  { %239 = vmatmul.msk.f32.gmra.mxu0 %vm36_vm0, %v92_v58 }
 0x18b   :  { %v124_v63 = vpop.f32.mrf.mxu0 }
 0x18c   :  { %v125_v0 = vadd.f32 %v263_v62, %v124_v63 }
 0x18e   :  { %v130_v1 = vmax.f32 %v125_v0, 0.0 }
 0x190   :  { %181 = vst [vmem:[#allocation4] sm:$0xff] %v130_v1  ;;  %168 = vmatmul.f32.vlgmr.msra.gmra.mxu1 %v130_v1 }
 0x193   :  { %v127_v2 = vpop.f32.mrf.mxu0 }
 0x194   :  { %v128_v3 = vadd.f32 %v263_v62, %v127_v2 }
 0x196   :  { %v131_v4 = vmax.f32 %v128_v3, 0.0 }
 0x198   :  { %182 = vst [vmem:[#allocation4 + $0x8] sm:$0xff] %v131_v4  ;;  %171 = vmatmul.f32.vlgmr.msra.gmra.mxu2 %v131_v4 }
 0x199   :  { %210 = dma.vmem_to_hbm [thread:$0]  %s203_s17, 256, %s205_s19, [#allocation5], %s346_s20, %s346_s20, %s347_s5  }
 0x20d   :  { %v169_v6 = vpop.f32.mrf.mxu1 }
 0x20e   :  { %v170_v8 = vadd.f32 %v264_v5, %v169_v6 }
 0x210   :  { %v177_v9 = vadd.f32 %v175_v7, %v170_v8  ;;  %183 = vst.msk [vmem:[#allocation6] sm:$0xff] %vm36_vm0, %v170_v8 }
 0x212   :  { %179 = vst.msk [vmem:[#allocation2] sm:$0xff] %vm36_vm0, %v177_v9 }
 0x21b   :  { %v172_v10 = vpop.f32.mrf.mxu2 }
 0x21c   :  { %v173_v12 = vadd.f32 %v264_v5, %v172_v10 }
 0x21e   :  { %v178_v13 = vadd.f32 %v176_v11, %v173_v12  ;;  %184 = vst.msk [vmem:[#allocation6 + $0x8] sm:$0xff] %vm36_vm0, %v173_v12 }
 0x21f   :  { %223 = dma.vmem_to_hbm [thread:$0]  %s216_s25, 256, %s218_s2, [#allocation5], %s346_s20, %s346_s20, %s347_s5  }
 0x220   :  { %180 = vst.msk [vmem:[#allocation2 + $0x8] sm:$0xff] %vm36_vm0, %v178_v13 }
 0x221   :  { %197 = dma.vmem_to_hbm [thread:$0]  %s190_s4, 256, %s192_s11, [#allocation3], %s346_s20, %s346_s20, %s347_s5  }
 0x222   :  { %341 = dma.done.wait [#allocation3], 256  }
 0x223   :  { %342 = vsyncadd [#allocation3], 4294967040 }
 0x224   :  { %343 = dma.done.wait [#allocation5], 512  }
 0x225   :  { %344 = vsyncadd [#allocation5], 4294966784 }
 0x226   :  { %236 = vsyncpa [#allocation3], 1 }
 0x227   :  { %237 = vsyncpa [#allocation5], 1 }

// kernel: tpu_custom_call.1
= control target key start
LH: loop header
LB: loop body
LE: loop exit
PB: predicated region body
PF: predicated region fallthrough
CT: control target
= control target key end

     0   :  { %16 = vsyncpa [#allocation3], 0  ;;  %vm36_vm0 = vcmask 261120   ;;  %s527_s0 = inlined_call_operand.vmem [shape: f32[16,32], index: 0, kind: input, shape index: {}]   ;;  %s528_s1 = inlined_call_operand.vmem [shape: f32[16,32], index: 1, kind: input, shape index: {}]   ;;  %s529_s2 = inlined_call_operand.vmem [shape: f32[1,32], index: 2, kind: input, shape index: {}]   ;;  %s530_s3 = inlined_call_operand.vmem [shape: f32[1,32], index: 3, kind: input, shape index: {}]   ;;  %s531_s4 = inlined_call_operand.vmem [shape: f32[32,128], index: 4, kind: input, shape index: {}]   ;;  %s532_s5 = inlined_call_operand.vmem [shape: f32[1,128], index: 5, kind: input, shape index: {}]   ;;  %s533_s6 = inlined_call_operand.vmem [shape: f32[128,32], index: 6, kind: input, shape index: {}]   ;;  %s534_s7 = inlined_call_operand.vmem [shape: f32[1,32], index: 7, kind: input, shape index: {}]   ;;  %s535_s8 = inlined_call_operand.hbm [shape: f32[16,32], index: 8, kind: output, shape index: {0}]   ;;  %s536_s9 = inlined_call_operand.hbm [shape: f32[16,128], index: 9, kind: output, shape index: {1}]   ;;  %s537_s10 = inlined_call_operand.hbm [shape: f32[16,32], index: 10, kind: output, shape index: {2}]  }
   0x1   :  { %v34_v0 = vld [vmem:[%s527_s0] sm:$0xff] }
   0x2   :  { %v37_v1 = vsel %vm36_vm0, %v34_v0, 0.0 }
   0x3   :  { %38 = vadd.xlane.f32.xlu0 %v37_v1 }
   0x4   :  { %17 = vsyncpa [#allocation5], 0  ;;  %v35_v2 = vld [vmem:[%s527_s0 + $0x8] sm:$0xff]  ;;  %v96_v14 = vld [vmem:[%s531_s4 + $0x18] sm:$0xff]  ;;  %s345_s0 = smov [#allocation4]   ;;  %s204_s19 = sshll.u32 %s536_s9, 4  ;;  %s205_s19 = int_to_ptr.hbm [resolvable:$true] %s204_s19 }
   0x5   :  { %v40_v3 = vsel %vm36_vm0, %v35_v2, 0.0  ;;  %119 = vmatpush.msra.mxu0 %v96_v14  ;;  %v95_v15 = vld [vmem:[%s531_s4 + $0x10] sm:$0xff]  ;;  %v94_v16 = vld [vmem:[%s531_s4 + $0x8] sm:$0xff]  ;;  %v93_v17 = vld [vmem:[%s531_s4] sm:$0xff]  ;;  %s202_s17 = sshll.u32 %s345_s0, 4  ;;  %s346_s20 = smov 128   ;;  %s203_s17 = int_to_ptr.vmem [resolvable:$true] %s202_s17 }
   0x6   :  { %v147_v21 = vld [vmem:[%s533_s6 + $0x78] sm:$0xff]  ;;  %v146_v22 = vld [vmem:[%s533_s6 + $0x70] sm:$0xff]  ;;  %v145_v23 = vld [vmem:[%s533_s6 + $0x68] sm:$0xff]  ;;  %s348_s9 = smov [#allocation6]   ;;  %s349_s29 = smov [#allocation2]  }
   0x7   :  { %120 = vmatpush.msra.mxu0 %v95_v15  ;;  %152 = vmatpush.msra.mxu1 %v147_v21  ;;  %v144_v26 = vld [vmem:[%s533_s6 + $0x60] sm:$0xff]  ;;  %v143_v29 = vld [vmem:[%s533_s6 + $0x58] sm:$0xff]  ;;  %v142_v31 = vld [vmem:[%s533_s6 + $0x50] sm:$0xff]  ;;  %s215_s25 = sshll.u32 %s348_s9, 4  ;;  %s189_s4 = sshll.u32 %s349_s29, 4  ;;  %s216_s25 = int_to_ptr.vmem [resolvable:$true] %s215_s25  ;;  %s190_s4 = int_to_ptr.vmem [resolvable:$true] %s189_s4 }
   0x8   :  { %240 = vmatpush.msra.mxu2 %v147_v21  ;;  %v141_v33 = vld [vmem:[%s533_s6 + $0x48] sm:$0xff]  ;;  %v140_v35 = vld [vmem:[%s533_s6 + $0x40] sm:$0xff]  ;;  %v139_v38 = vld [vmem:[%s533_s6 + $0x38] sm:$0xff]  ;;  %s191_s11 = sshll.u32 %s535_s8, 4  ;;  %s192_s11 = int_to_ptr.hbm [resolvable:$true] %s191_s11 }
   0x9   :  { %121 = vmatpush.msra.mxu0 %v94_v16  ;;  %153 = vmatpush.msra.mxu1 %v146_v22  ;;  %v261_v41 = vld [vmem:[%s529_s2] ss:$0 sm:$0xff]  ;;  %v138_v42 = vld [vmem:[%s533_s6 + $0x30] sm:$0xff]  ;;  %v137_v47 = vld [vmem:[%s533_s6 + $0x28] sm:$0xff]  ;;  %s217_s2 = sshll.u32 %s537_s10, 4  ;;  %s218_s2 = int_to_ptr.hbm [resolvable:$true] %s217_s2 }
   0xa   :  { %241 = vmatpush.msra.mxu2 %v146_v22  ;;  %v262_v46 = vld [vmem:[%s530_s3] ss:$0 sm:$0xff]  ;;  %v135_v53 = vld [vmem:[%s533_s6 + $0x18] sm:$0xff]  ;;  %v134_v59 = vld [vmem:[%s533_s6 + $0x10] sm:$0xff] }
   0xb   :  { %41 = vadd.xlane.f32.xlu0 %v40_v3  ;;  %122 = vmatpush.msra.mxu0 %v93_v17  ;;  %v136_v50 = vld [vmem:[%s533_s6 + $0x20] sm:$0xff]  ;;  %v133_v60 = vld [vmem:[%s533_s6 + $0x8] sm:$0xff] }
   0xc   :  { %154 = vmatpush.msra.mxu1 %v145_v23  ;;  %242 = vmatpush.msra.mxu2 %v145_v23  ;;  %v132_v61 = vld [vmem:[%s533_s6] sm:$0xff] }
   0xd   :  { %v263_v62 = vld [vmem:[%s532_s5] ss:$0 sm:$0xff]  ;;  %s347_s5 = smov 8  }
   0xe   :  { %155 = vmatpush.msra.mxu1 %v144_v26  ;;  %243 = vmatpush.msra.mxu2 %v144_v26 }
  0x10   :  { %156 = vmatpush.msra.mxu1 %v143_v29  ;;  %244 = vmatpush.msra.mxu2 %v143_v29 }
  0x12   :  { %157 = vmatpush.msra.mxu1 %v142_v31  ;;  %245 = vmatpush.msra.mxu2 %v142_v31 }
  0x14   :  { %158 = vmatpush.msra.mxu1 %v141_v33  ;;  %246 = vmatpush.msra.mxu2 %v141_v33 }
  0x16   :  { %159 = vmatpush.msra.mxu1 %v140_v35  ;;  %247 = vmatpush.msra.mxu2 %v140_v35 }
  0x18   :  { %160 = vmatpush.msra.mxu1 %v139_v38  ;;  %248 = vmatpush.msra.mxu2 %v139_v38 }
  0x1a   :  { %161 = vmatpush.msra.mxu1 %v138_v42  ;;  %249 = vmatpush.msra.mxu2 %v138_v42 }
  0x1c   :  { %162 = vmatpush.msra.mxu1 %v137_v47  ;;  %250 = vmatpush.msra.mxu2 %v137_v47 }
  0x1e   :  { %163 = vmatpush.msra.mxu1 %v136_v50  ;;  %251 = vmatpush.msra.mxu2 %v136_v50 }
  0x20   :  { %164 = vmatpush.msra.mxu1 %v135_v53  ;;  %252 = vmatpush.msra.mxu2 %v135_v53 }
  0x22   :  { %165 = vmatpush.msra.mxu1 %v134_v59  ;;  %253 = vmatpush.msra.mxu2 %v134_v59 }
  0x24   :  { %166 = vmatpush.msra.mxu1 %v133_v60  ;;  %254 = vmatpush.msra.mxu2 %v133_v60 }
  0x26   :  { %167 = vmatpush.msra.mxu1 %v132_v61  ;;  %255 = vmatpush.msra.mxu2 %v132_v61 }
  0x76   :  { %v39_v4 = vpop.xlane.xlu0 %38 }
  0x77   :  { %v43_v5 = vmul.f32 0.03125, %v39_v4 }
  0x79   :  { %v413_v6 = vsub.f32 %v34_v0, %v43_v5  ;;  %v264_v5 = vld [vmem:[%s534_s7] ss:$0 sm:$0xff] }
  0x7b   :  { %v47_v7 = vmul.f32 %v413_v6, %v413_v6 }
  0x7d   :  { %v49_v8 = vsel %vm36_vm0, %v47_v7, 0.0  ;;  %v175_v7 = vld [vmem:[%s528_s1] sm:$0xff] }
  0x7e   :  { %50 = vadd.xlane.f32.xlu1 %v49_v8  ;;  %v42_v9 = vpop.xlane.xlu0 %41 }
  0x7f   :  { %v44_v10 = vmul.f32 0.03125, %v42_v9 }
  0x81   :  { %v418_v11 = vsub.f32 %v35_v2, %v44_v10 }
  0x83   :  { %v48_v12 = vmul.f32 %v418_v11, %v418_v11 }
  0x85   :  { %v52_v13 = vsel %vm36_vm0, %v48_v12, 0.0 }
  0x86   :  { %53 = vadd.xlane.f32.xlu1 %v52_v13 }
  0xf1   :  { %v51_v18 = vpop.xlane.xlu1 %50 }
  0xf2   :  { %v55_v19 = vmul.f32 0.03125, %v51_v18 }
  0xf4   :  { %v57_v20 = vadd.f32 1e-05, %v55_v19 }
  0xf6   :  { %265 = vrsqrt.f32 %v57_v20  ;;  %vm65_vm2 = vweird.f32 %v57_v20 }
  0xf9   :  { %v54_v24 = vpop.xlane.xlu1 %53 }
  0xfa   :  { %v56_v25 = vmul.f32 0.03125, %v54_v24 }
  0xfc   :  { %v266_v27 = vpop.eup %265  ;;  %v58_v28 = vadd.f32 1e-05, %v56_v25 }
  0xfd   :  { %v60_v30 = vmul.f32 %v266_v27, %v57_v20  ;;  %vm66_vm1 = vweird.f32 %v266_v27 }
  0xfe   :  { %267 = vrsqrt.f32 %v58_v28  ;;  %vm67_vm3 = vmor %vm65_vm2, %vm66_vm1  ;;  %vm75_vm5 = vweird.f32 %v58_v28 }
  0xff   :  { %v61_v32 = vmul.f32 %v266_v27, %v60_v30 }
 0x101   :  { %v62_v34 = vmul.f32 0.5, %v61_v32 }
 0x103   :  { %v63_v36 = vsub.f32 1.5, %v62_v34 }
 0x104   :  { %v268_v37 = vpop.eup %267 }
 0x105   :  { %v64_v39 = vmul.f32 %v266_v27, %v63_v36  ;;  %v70_v40 = vmul.f32 %v268_v37, %v58_v28  ;;  %vm76_vm4 = vweird.f32 %v268_v37 }
 0x106   :  { %vm77_vm6 = vmor %vm75_vm5, %vm76_vm4 }
 0x107   :  { %v68_v43 = vsel %vm67_vm3, %v266_v27, %v64_v39  ;;  %v71_v44 = vmul.f32 %v268_v37, %v70_v40 }
 0x108   :  { %v79_v45 = vmul.f32 %v68_v43, %v413_v6 }
 0x109   :  { %v72_v48 = vmul.f32 0.5, %v71_v44 }
 0x10a   :  { %v85_v49 = vmul.f32 %v261_v41, %v79_v45 }
 0x10b   :  { %v73_v51 = vsub.f32 1.5, %v72_v48 }
 0x10c   :  { %v91_v52 = vadd.f32 %v262_v46, %v85_v49 }
 0x10d   :  { %v74_v54 = vmul.f32 %v268_v37, %v73_v51 }
 0x10e   :  { %238 = vmatmul.msk.f32.vlgmr.msra.gmra.mxu0 %vm36_vm0, %v91_v52 }
 0x10f   :  { %v78_v55 = vsel %vm77_vm6, %v268_v37, %v74_v54 }
 0x110   :  { %v80_v56 = vmul.f32 %v78_v55, %v418_v11  ;;  %v176_v11 = vld [vmem:[%s528_s1 + $0x8] sm:$0xff] }
 0x112   :  { %v86_v57 = vmul.f32 %v261_v41, %v80_v56 }
 0x114   :  { %v92_v58 = vadd.f32 %v262_v46, %v86_v57 }
 0x116   :  { %239 = vmatmul.msk.f32.gmra.mxu0 %vm36_vm0, %v92_v58 }
 0x18b   :  { %v124_v63 = vpop.f32.mrf.mxu0 }
 0x18c   :  { %v125_v0 = vadd.f32 %v263_v62, %v124_v63 }
 0x18e   :  { %v130_v1 = vmax.f32 %v125_v0, 0.0 }
 0x190   :  { %181 = vst [vmem:[#allocation4] sm:$0xff] %v130_v1  ;;  %168 = vmatmul.f32.vlgmr.msra.gmra.mxu1 %v130_v1 }
 0x193   :  { %v127_v2 = vpop.f32.mrf.mxu0 }
 0x194   :  { %v128_v3 = vadd.f32 %v263_v62, %v127_v2 }
 0x196   :  { %v131_v4 = vmax.f32 %v128_v3, 0.0 }
 0x198   :  { %182 = vst [vmem:[#allocation4 + $0x8] sm:$0xff] %v131_v4  ;;  %171 = vmatmul.f32.vlgmr.msra.gmra.mxu2 %v131_v4 }
 0x199   :  { %210 = dma.vmem_to_hbm [thread:$0]  %s203_s17, 256, %s205_s19, [#allocation5], %s346_s20, %s346_s20, %s347_s5  }
 0x20d   :  { %v169_v6 = vpop.f32.mrf.mxu1 }
 0x20e   :  { %v170_v8 = vadd.f32 %v264_v5, %v169_v6 }
 0x210   :  { %v177_v9 = vadd.f32 %v175_v7, %v170_v8  ;;  %183 = vst.msk [vmem:[#allocation6] sm:$0xff] %vm36_vm0, %v170_v8 }
 0x212   :  { %179 = vst.msk [vmem:[#allocation2] sm:$0xff] %vm36_vm0, %v177_v9 }
 0x21b   :  { %v172_v10 = vpop.f32.mrf.mxu2 }
 0x21c   :  { %v173_v12 = vadd.f32 %v264_v5, %v172_v10 }
 0x21e   :  { %v178_v13 = vadd.f32 %v176_v11, %v173_v12  ;;  %184 = vst.msk [vmem:[#allocation6 + $0x8] sm:$0xff] %vm36_vm0, %v173_v12 }
 0x21f   :  { %223 = dma.vmem_to_hbm [thread:$0]  %s216_s25, 256, %s218_s2, [#allocation5], %s346_s20, %s346_s20, %s347_s5  }
 0x220   :  { %180 = vst.msk [vmem:[#allocation2 + $0x8] sm:$0xff] %vm36_vm0, %v178_v13 }
 0x221   :  { %197 = dma.vmem_to_hbm [thread:$0]  %s190_s4, 256, %s192_s11, [#allocation3], %s346_s20, %s346_s20, %s347_s5  }
 0x222   :  { %341 = dma.done.wait [#allocation3], 256  }
 0x223   :  { %342 = vsyncadd [#allocation3], 4294967040 }
 0x224   :  { %343 = dma.done.wait [#allocation5], 512  }
 0x225   :  { %344 = vsyncadd [#allocation5], 4294966784 }
 0x226   :  { %236 = vsyncpa [#allocation3], 1 }
 0x227   :  { %237 = vsyncpa [#allocation5], 1 }

</bundles_post_ra>
